<compile_context>
chip_gen: v7x
topology: tpu7x:2x2x1
jax: 0.10.0
libtpu: 0.0.40
codegen_flags: <defaults>
</compile_context>

<pallas_src>
import numpy as np
import jax
import jax.numpy as jnp
from jax.experimental import pallas as pl
from jax.experimental.pallas import tpu as pltpu

F32 = jnp.float32
BF16 = jnp.bfloat16


# ----------------------------- fused Pallas kernel -----------------------------

def gps_fused_kernel(
    # graph data / dense graph operators (constant, DMA'd once)
    xnp_ref, ea_in_ref, g_ref, s_ref, a_ref, p_ref,
    # embedding weights
    wnp_ref, bnp_ref, we_ref, be_ref,
    # consolidated per-layer slabs
    wsq_ref, wm1_ref, vec_ref,
    # readout
    wl_ref, bl_ref,
    # output
    out_ref,
):
    C = wnp_ref.shape[1]
    L = wsq_ref.shape[0]

    # ---- fused node/pe embedding + edge embedding (K padded to 32, not 128) ----
    x = jnp.dot(xnp_ref[...], wnp_ref[...], preferred_element_type=F32) + bnp_ref[...]
    ea = jnp.dot(ea_in_ref[...], we_ref[...], preferred_element_type=F32) + be_ref[...]

    g = g_ref[...]                       # [E, N] bf16 one-hot gather of x[src]
    s = s_ref[...]                       # [N, E] bf16 one-hot scatter-add to dst
    a = a_ref[...]                       # [N, N] bf16 GCN-normalized adjacency

    # ---- all L GPS layers, fully unrolled in-kernel (no grid steps, no per-layer DMA) ----
    # TODO(synk): for large L switch to lax.fori_loop (dynamic first-axis ref indexing).
    for l in range(L):
        wsq = wsq_ref[l]                 # [5C, C] bf16: Wg1 | Wg2 | Wgcn | Wm2 on rows
        wg1, wg2 = wsq[0:C], wsq[C:2 * C]
        wgcn, wm2 = wsq[2 * C:3 * C], wsq[3 * C:5 * C]
        wm1 = wm1_ref[l]                 # [C, 2C] bf16
        vc = vec_ref[l]                  # [9, 2C] f32 folded biases / BN affines
        bg1, bn1s, c1 = vc[0:1, :C], vc[1:2, :C], vc[2:3, :C]
        s23, h23c, bm2 = vc[3:4, :C], vc[4:5, :C], vc[5:6, :C]
        bn3s, bn3h = vc[6:7, :C], vc[7:8, :C]
        bm1 = vc[8:9, :]

        xb = x.astype(BF16)              # single bf16 shadow of x per layer

        # GINEConv branch: agg_i = sum_{j->i} relu(x_j + e_ij); nn(agg + x)   (eps = 0)
        xe = jnp.dot(g, xb, preferred_element_type=F32)                  # gather x[src] [E,C]
        msg = jnp.maximum(xe + ea, 0.0)
        agg = jnp.dot(s, msg.astype(BF16), preferred_element_type=F32)   # scatter-add  [N,C]
        pre = (agg + x).astype(BF16)
        hg = jnp.maximum(jnp.dot(pre, wg1, preferred_element_type=F32) + bg1, 0.0)
        # norm1 affine with bg2 folded into c1
        h1 = (jnp.dot(hg.astype(BF16), wg2, preferred_element_type=F32) + x) * bn1s + c1

        # GCNConv branch; norm1 + norm2 (h2 + h3) folded into (s23, h23c), bgcn absorbed
        xw = jnp.dot(xb, wgcn, preferred_element_type=F32)
        h23 = (jnp.dot(a, xw.astype(BF16), preferred_element_type=F32) + x) * s23 + h23c

        out = h1 + h23                                                   # == h1 + h2 + h3
        m = jnp.maximum(
            jnp.dot(out.astype(BF16), wm1, preferred_element_type=F32) + bm1, 0.0)
        m = jnp.dot(m.astype(BF16), wm2, preferred_element_type=F32) + bm2
        x = (out + m) * bn3s + bn3h                                      # norm3

    # ---- global_add_pool + final Linear, kept in f32 for accuracy (negligible work) ----
    pooled = jnp.dot(p_ref[...], x, preferred_element_type=F32)          # [B, C] f32
    out_ref[...] = jnp.dot(pooled, wl_ref[...], preferred_element_type=F32) + bl_ref[...]


# ----------------------------- wrapper -----------------------------

def gps_fused_call(xnp, ea_in, G, S, A, P, packed):
    N, Kin = xnp.shape
    E = ea_in.shape[0]
    B = P.shape[0]
    L = packed['Wsq'].shape[0]
    C = packed['wnp'].shape[1]
    Dout = packed['wl'].shape[1]

    args = [xnp, ea_in, G, S, A, P,
            packed['wnp'], packed['bnp'], packed['we'], packed['be'],
            packed['Wsq'], packed['Wm1'], packed['Vec'],
            packed['wl'], packed['bl']]

    # No grid: every array is a single full-block VMEM resident, DMA'd exactly once.
    in_specs = [pl.BlockSpec(memory_space=pltpu.MemorySpace.VMEM) for _ in args]
    out_specs = pl.BlockSpec(memory_space=pltpu.MemorySpace.VMEM)

    # advisory cost estimate (MAC*2 flops)
    macs_layer = 2 * E * N * C + 7 * N * C * C + N * N * C
    flops = 2 * (N * Kin * C + E * Kin * C          # fused embeddings
                 + L * macs_layer                   # layers
                 + B * N * C + B * C * Dout)        # pool + readout
    bytes_accessed = int(sum(int(np.prod(a.shape)) * a.dtype.itemsize for a in args)
                         + B * Dout * 4)

    return pl.pallas_call(
        gps_fused_kernel,
        out_shape=jax.ShapeDtypeStruct((B, Dout), F32),
        in_specs=in_specs,
        out_specs=out_specs,
        compiler_params=pltpu.CompilerParams(
            vmem_limit_bytes=32 * 1024 * 1024),       # plenty for these shapes, all chips
        cost_estimate=pl.CostEstimate(flops=int(flops), transcendentals=0,
                                      bytes_accessed=bytes_accessed),
    )(*args)


# ----------------------------- pure-JAX reference (original, unfolded math, f32) -----------------------------

def gps_forward_ref(x_raw, pe_raw, ea_raw, G, S, A, P, params):
    x = x_raw @ params['wn'] + params['bn'] + pe_raw @ params['wp'] + params['bp']
    ea = ea_raw @ params['we'] + params['be']
    for lp in params['layers']:
        msg = jnp.maximum(G @ x + ea, 0.0)
        pre = S @ msg + x
        h1 = jnp.maximum(pre @ lp['wg1'] + lp['bg1'], 0.0) @ lp['wg2'] + lp['bg2'] + x
        h1 = h1 * lp['bn1s'] + lp['bn1h']
        h2 = A @ (x @ lp['wgcn']) + lp['bgcn'] + x
        h2 = h2 * lp['bn1s'] + lp['bn1h']              # module re-uses norm1 here
        h3 = h2 * lp['bn2s'] + lp['bn2h']              # norm2 on last h
        out = h1 + h2 + h3
        m = jnp.maximum(out @ lp['wm1'] + lp['bm1'], 0.0) @ lp['wm2'] + lp['bm2']
        x = (out + m) * lp['bn3s'] + lp['bn3h']
    return P @ x @ params['wl'] + params['bl']         # [B, 11]


# ----------------------------- parameter init & glue packing -----------------------------

def _linear_t(key, fan_in, fan_out):
    kw, kb = jax.random.split(key)
    wt = (jax.random.normal(kw, (fan_in, fan_out), F32) / np.sqrt(fan_in)).astype(F32)
    b = (0.02 * jax.random.normal(kb, (1, fan_out), F32)).astype(F32)
    return wt, b


def _bn_affine(key, C, eps=1e-5):
    k1, k2, k3, k4 = jax.random.split(key, 4)
    gamma = 1.0 + 0.1 * jax.random.normal(k1, (1, C), F32)
    beta = 0.1 * jax.random.normal(k2, (1, C), F32)
    rmean = 0.1 * jax.random.normal(k3, (1, C), F32)
    rvar = 1.0 + 0.1 * jnp.abs(jax.random.normal(k4, (1, C), F32))
    scale = gamma * jax.lax.rsqrt(rvar + eps)
    shift = beta - rmean * scale
    return scale.astype(F32), shift.astype(F32)


def init_params(key, C, num_layers):
    keys = iter(jax.random.split(key, 8 + 8 * num_layers))
    wn, bn = _linear_t(next(keys), 9, C)      # node_emb: Linear(9, C)
    wp, bp = _linear_t(next(keys), 20, C)     # pe_lin:   Linear(20, C)
    we, be = _linear_t(next(keys), 3, C)      # edge_emb: Linear(3, C)
    wl, bl = _linear_t(next(keys), C, 11)     # lin:      Linear(C, 11)
    params = {'wn': wn, 'bn': bn, 'wp': wp, 'bp': bp, 'we': we, 'be': be,
              'wl': wl, 'bl': bl, 'layers': []}
    for _ in range(num_layers):
        wg1, bg1 = _linear_t(next(keys), C, C)        # GINE nn: Linear(C, C)
        wg2, bg2 = _linear_t(next(keys), C, C)        # GINE nn: Linear(C, C)
        wgcn, bgcn = _linear_t(next(keys), C, C)      # GCNConv(C, C)
        wm1, bm1 = _linear_t(next(keys), C, 2 * C)    # GPSConv mlp: Linear(C, 2C)
        wm2, bm2 = _linear_t(next(keys), 2 * C, C)    # GPSConv mlp: Linear(2C, C)
        bn1s, bn1h = _bn_affine(next(keys), C)
        bn2s, bn2h = _bn_affine(next(keys), C)
        bn3s, bn3h = _bn_affine(next(keys), C)
        params['layers'].append(dict(
            wg1=wg1, bg1=bg1, wg2=wg2, bg2=bg2, wgcn=wgcn, bgcn=bgcn,
            wm1=wm1, bm1=bm1, wm2=wm2, bm2=bm2,
            bn1s=bn1s, bn1h=bn1h, bn2s=bn2s, bn2h=bn2h, bn3s=bn3s, bn3h=bn3h))
    return params


def pack_params(params, pad_k=32, pad_out=128):
    """Glue: fuse embeds, fold affines/biases, consolidate per-layer params into slabs."""
    C = params['wn'].shape[1]
    wnp = jnp.concatenate([params['wn'], params['wp']], axis=0)      # [29, C]
    wnp = jnp.pad(wnp, ((0, pad_k - wnp.shape[0]), (0, 0)))
    we = jnp.pad(params['we'], ((0, pad_k - params['we'].shape[0]), (0, 0)))
    wl = jnp.pad(params['wl'], ((0, 0), (0, pad_out - params['wl'].shape[1])))
    bl = jnp.pad(params['bl'], ((0, 0), (0, pad_out - params['bl'].shape[1])))

    wsq_list, wm1_list, vec_list = [], [], []
    for lp in params['layers']:
        # [5C, C] weight slab: Wg1 | Wg2 | Wgcn | Wm2 along the row/contraction axis
        wsq_list.append(jnp.concatenate(
            [lp['wg1'], lp['wg2'], lp['wgcn'], lp['wm2']], axis=0))
        wm1_list.append(lp['wm1'])                                   # [C, 2C]
        # folded biases / BN affines:
        #   h1 = (hg@wg2 + x)*bn1s + (bn1h + bg2*bn1s)
        #   h2 + h3 = (A@(x@wgcn) + x)*s23 + h23   with bgcn folded in
        c1 = lp['bn1h'] + lp['bg2'] * lp['bn1s']
        s23 = lp['bn1s'] * (1.0 + lp['bn2s'])
        h23 = lp['bn1h'] * (1.0 + lp['bn2s']) + lp['bn2h'] + lp['bgcn'] * s23
        rows_c = jnp.concatenate(
            [lp['bg1'], lp['bn1s'], c1, s23, h23,
             lp['bm2'], lp['bn3s'], lp['bn3h']], axis=0)             # [8, C]
        rows_c = jnp.pad(rows_c, ((0, 0), (0, C)))                   # [8, 2C]
        vec_list.append(jnp.concatenate([rows_c, lp['bm1']], axis=0))  # [9, 2C]

    return {
        'wnp': wnp.astype(BF16), 'bnp': params['bn'] + params['bp'],
        'we': we.astype(BF16), 'be': params['be'],
        'wl': wl, 'bl': bl,                                          # f32 readout (accuracy)
        'Wsq': jnp.stack(wsq_list).astype(BF16),                     # [L, 5C, C]
        'Wm1': jnp.stack(wm1_list).astype(BF16),                     # [L, C, 2C]
        'Vec': jnp.stack(vec_list),                                  # [L, 9, 2C] f32
    }


# ----------------------------- main -----------------------------

if __name__ == "__main__":
    N, E, C, B, L = 16, 32, 32, 2, 2       # nodes, edges, channels, graphs, num_layers
    KIN = 32                               # fused embed contraction dim (29 real, padded)
    key = jax.random.PRNGKey(0)
    (k_x, k_pe, k_ea, k_src, k_dst, k_vsrc, k_voff, k_vw, k_par) = jax.random.split(key, 9)

    # raw graph data (mirrors data.x [N,9], data.pe [N,20], data.edge_attr [E,3], ...)
    x_raw = jax.random.normal(k_x, (N, 9), F32)
    pe_raw = jax.random.normal(k_pe, (N, 20), F32)
    ea_raw = jax.random.normal(k_ea, (E, 3), F32)
    src = jax.random.randint(k_src, (E,), 0, N)
    dst = jax.random.randint(k_dst, (E,), 0, N)
    vsrc = jax.random.randint(k_vsrc, (E,), 0, N)
    vdst = (vsrc + jax.random.randint(k_voff, (E,), 1, N)) % N      # vae edges, no self-loops
    vw = jax.random.uniform(k_vw, (E,), F32, 0.1, 1.0)              # vae_edge_weight
    batch = jnp.repeat(jnp.arange(B), N // B)                        # data.batch

    # dense helper matrices (glue)
    G = jax.nn.one_hot(src, N, dtype=F32)            # [E, N] gathers x[src] per edge
    S = jax.nn.one_hot(dst, N, dtype=F32).T          # [N, E] scatter-adds messages to dst
    # GCN symmetric normalization (add self-loops w=1, deg^{-1/2} A deg^{-1/2}) as dense A
    row = jnp.concatenate([vsrc, jnp.arange(N)])
    col = jnp.concatenate([vdst, jnp.arange(N)])
    w = jnp.concatenate([vw, jnp.ones((N,), F32)])
    deg = jnp.zeros((N,), F32).at[col].add(w)
    dinv = jnp.where(deg > 0, jax.lax.rsqrt(deg), 0.0)
    norm = dinv[row] * w * dinv[col]
    A = jnp.zeros((N, N), F32).at[col, row].add(norm)  # A[i, j] = norm of edge j -> i
    P = jax.nn.one_hot(batch, B, dtype=F32).T          # [B, N] global_add_pool matrix

    # fused-embed inputs: [x | pe] padded to K=32; edge_attr padded to K=32; bf16 MXU feeds
    xnp = jnp.pad(jnp.concatenate([x_raw, pe_raw], axis=1), ((0, 0), (0, KIN - 29)))
    ea_in = jnp.pad(ea_raw, ((0, 0), (0, KIN - 3)))

    params = init_params(k_par, C, L)
    packed = pack_params(params, pad_k=KIN, pad_out=128)

    # bf16 graph operators for the MXU (one-hots exact; A loses <1e-2 rel precision);
    # pooling matrix P stays f32 (f32 readout per the correctness review).
    Gb, Sb, Ab = (m.astype(BF16) for m in (G, S, A))

    fwd = jax.jit(gps_fused_call)
    out_full = fwd(xnp.astype(BF16), ea_in.astype(BF16), Gb, Sb, Ab, P, packed)
    out_full = jax.block_until_ready(out_full)
    out = out_full[:, :11]

    ref = gps_forward_ref(x_raw, pe_raw, ea_raw, G, S, A, P, params)
    rel_err = float(jnp.max(jnp.abs(out - ref)) / (jnp.max(jnp.abs(ref)) + 1e-6))
    assert out.shape == (B, 11), out.shape
    assert rel_err < 5e-2, f"relative error too large: {rel_err}"
    print("KERNEL_OK")
</pallas_src>

<mosaic_0001>
module attributes {stable_mosaic.version = 11 : i64} {
  func.func @gps_fused_kernel(%arg0: memref<16x32xbf16, #tpu.memory_space<vmem>>, %arg1: memref<32x32xbf16, #tpu.memory_space<vmem>>, %arg2: memref<32x16xbf16, #tpu.memory_space<vmem>>, %arg3: memref<16x32xbf16, #tpu.memory_space<vmem>>, %arg4: memref<16x16xbf16, #tpu.memory_space<vmem>>, %arg5: memref<2x16xf32, #tpu.memory_space<vmem>>, %arg6: memref<32x32xbf16, #tpu.memory_space<vmem>>, %arg7: memref<1x32xf32, #tpu.memory_space<vmem>>, %arg8: memref<32x32xbf16, #tpu.memory_space<vmem>>, %arg9: memref<1x32xf32, #tpu.memory_space<vmem>>, %arg10: memref<2x160x32xbf16, #tpu.memory_space<vmem>>, %arg11: memref<2x32x64xbf16, #tpu.memory_space<vmem>>, %arg12: memref<2x9x64xf32, #tpu.memory_space<vmem>>, %arg13: memref<32x128xf32, #tpu.memory_space<vmem>>, %arg14: memref<1x128xf32, #tpu.memory_space<vmem>>, %arg15: memref<2x128xf32, #tpu.memory_space<vmem>>) attributes {dimension_semantics = [], scalar_prefetch = 0 : i64, scratch_operands = 0 : i64, tpu.core_type = #tpu.core_type<tc>} {
    %c0 = arith.constant 0 : index
    %c0_0 = arith.constant 0 : index
    %0 = vector.load %arg0[%c0, %c0_0] : memref<16x32xbf16, #tpu.memory_space<vmem>>, vector<16x32xbf16>
    %c0_1 = arith.constant 0 : index
    %c0_2 = arith.constant 0 : index
    %1 = vector.load %arg6[%c0_1, %c0_2] : memref<32x32xbf16, #tpu.memory_space<vmem>>, vector<32x32xbf16>
    %cst = arith.constant dense<0.000000e+00> : vector<16x32xf32>
    %2 = tpu.matmul %0, %1, %cst {dimension_numbers = #tpu.dot_dimension_numbers<[1], [0], [0], [1], [0, 0, 1, 1], [], []>} : vector<16x32xbf16>, vector<32x32xbf16>, vector<16x32xf32> -> vector<16x32xf32>
    %c0_3 = arith.constant 0 : index
    %c0_4 = arith.constant 0 : index
    %3 = vector.load %arg7[%c0_3, %c0_4] : memref<1x32xf32, #tpu.memory_space<vmem>>, vector<1x32xf32>
    %4 = vector.broadcast %3 : vector<1x32xf32> to vector<16x32xf32>
    %5 = arith.addf %2, %4 : vector<16x32xf32>
    %c0_5 = arith.constant 0 : index
    %c0_6 = arith.constant 0 : index
    %6 = vector.load %arg1[%c0_5, %c0_6] : memref<32x32xbf16, #tpu.memory_space<vmem>>, vector<32x32xbf16>
    %c0_7 = arith.constant 0 : index
    %c0_8 = arith.constant 0 : index
    %7 = vector.load %arg8[%c0_7, %c0_8] : memref<32x32xbf16, #tpu.memory_space<vmem>>, vector<32x32xbf16>
    %cst_9 = arith.constant dense<0.000000e+00> : vector<32x32xf32>
    %8 = tpu.matmul %6, %7, %cst_9 {dimension_numbers = #tpu.dot_dimension_numbers<[1], [0], [0], [1], [0, 0, 1, 1], [], []>} : vector<32x32xbf16>, vector<32x32xbf16>, vector<32x32xf32> -> vector<32x32xf32>
    %c0_10 = arith.constant 0 : index
    %c0_11 = arith.constant 0 : index
    %9 = vector.load %arg9[%c0_10, %c0_11] : memref<1x32xf32, #tpu.memory_space<vmem>>, vector<1x32xf32>
    %10 = vector.broadcast %9 : vector<1x32xf32> to vector<32x32xf32>
    %11 = arith.addf %8, %10 : vector<32x32xf32>
    %c0_12 = arith.constant 0 : index
    %c0_13 = arith.constant 0 : index
    %12 = vector.load %arg2[%c0_12, %c0_13] : memref<32x16xbf16, #tpu.memory_space<vmem>>, vector<32x16xbf16>
    %c0_14 = arith.constant 0 : index
    %c0_15 = arith.constant 0 : index
    %13 = vector.load %arg3[%c0_14, %c0_15] : memref<16x32xbf16, #tpu.memory_space<vmem>>, vector<16x32xbf16>
    %c0_16 = arith.constant 0 : index
    %c0_17 = arith.constant 0 : index
    %14 = vector.load %arg4[%c0_16, %c0_17] : memref<16x16xbf16, #tpu.memory_space<vmem>>, vector<16x16xbf16>
    %c0_18 = arith.constant 0 : index
    %c0_19 = arith.constant 0 : index
    %c0_20 = arith.constant 0 : index
    %15 = vector.load %arg10[%c0_18, %c0_19, %c0_20] : memref<2x160x32xbf16, #tpu.memory_space<vmem>>, vector<1x160x32xbf16>
    %16 = vector.shape_cast %15 : vector<1x160x32xbf16> to vector<160x32xbf16>
    %17 = vector.extract_strided_slice %16 {offsets = [0, 0], sizes = [32, 32], strides = [1, 1]} : vector<160x32xbf16> to vector<32x32xbf16>
    %18 = vector.extract_strided_slice %16 {offsets = [32, 0], sizes = [32, 32], strides = [1, 1]} : vector<160x32xbf16> to vector<32x32xbf16>
    %19 = vector.extract_strided_slice %16 {offsets = [64, 0], sizes = [32, 32], strides = [1, 1]} : vector<160x32xbf16> to vector<32x32xbf16>
    %20 = vector.extract_strided_slice %16 {offsets = [96, 0], sizes = [64, 32], strides = [1, 1]} : vector<160x32xbf16> to vector<64x32xbf16>
    %c0_21 = arith.constant 0 : index
    %c0_22 = arith.constant 0 : index
    %c0_23 = arith.constant 0 : index
    %21 = vector.load %arg11[%c0_21, %c0_22, %c0_23] : memref<2x32x64xbf16, #tpu.memory_space<vmem>>, vector<1x32x64xbf16>
    %22 = vector.shape_cast %21 : vector<1x32x64xbf16> to vector<32x64xbf16>
    %c0_24 = arith.constant 0 : index
    %c0_25 = arith.constant 0 : index
    %c0_26 = arith.constant 0 : index
    %23 = vector.load %arg12[%c0_24, %c0_25, %c0_26] : memref<2x9x64xf32, #tpu.memory_space<vmem>>, vector<1x9x64xf32>
    %24 = vector.shape_cast %23 : vector<1x9x64xf32> to vector<9x64xf32>
    %25 = vector.extract_strided_slice %24 {offsets = [0, 0], sizes = [1, 32], strides = [1, 1]} : vector<9x64xf32> to vector<1x32xf32>
    %26 = vector.extract_strided_slice %24 {offsets = [1, 0], sizes = [1, 32], strides = [1, 1]} : vector<9x64xf32> to vector<1x32xf32>
    %27 = vector.extract_strided_slice %24 {offsets = [2, 0], sizes = [1, 32], strides = [1, 1]} : vector<9x64xf32> to vector<1x32xf32>
    %28 = vector.extract_strided_slice %24 {offsets = [3, 0], sizes = [1, 32], strides = [1, 1]} : vector<9x64xf32> to vector<1x32xf32>
    %29 = vector.extract_strided_slice %24 {offsets = [4, 0], sizes = [1, 32], strides = [1, 1]} : vector<9x64xf32> to vector<1x32xf32>
    %30 = vector.extract_strided_slice %24 {offsets = [5, 0], sizes = [1, 32], strides = [1, 1]} : vector<9x64xf32> to vector<1x32xf32>
    %31 = vector.extract_strided_slice %24 {offsets = [6, 0], sizes = [1, 32], strides = [1, 1]} : vector<9x64xf32> to vector<1x32xf32>
    %32 = vector.extract_strided_slice %24 {offsets = [7, 0], sizes = [1, 32], strides = [1, 1]} : vector<9x64xf32> to vector<1x32xf32>
    %33 = vector.extract_strided_slice %24 {offsets = [8, 0], sizes = [1, 64], strides = [1, 1]} : vector<9x64xf32> to vector<1x64xf32>
    %34 = arith.truncf %5 : vector<16x32xf32> to vector<16x32xbf16>
    %cst_27 = arith.constant dense<0.000000e+00> : vector<32x32xf32>
    %35 = tpu.matmul %12, %34, %cst_27 {dimension_numbers = #tpu.dot_dimension_numbers<[1], [0], [0], [1], [0, 0, 1, 1], [], []>} : vector<32x16xbf16>, vector<16x32xbf16>, vector<32x32xf32> -> vector<32x32xf32>
    %36 = arith.addf %35, %11 : vector<32x32xf32>
    %cst_28 = arith.constant 0.000000e+00 : f32
    %37 = vector.broadcast %cst_28 : f32 to vector<32x32xf32>
    %38 = arith.maximumf %36, %37 : vector<32x32xf32>
    %39 = arith.truncf %38 : vector<32x32xf32> to vector<32x32xbf16>
    %cst_29 = arith.constant dense<0.000000e+00> : vector<16x32xf32>
    %40 = tpu.matmul %13, %39, %cst_29 {dimension_numbers = #tpu.dot_dimension_numbers<[1], [0], [0], [1], [0, 0, 1, 1], [], []>} : vector<16x32xbf16>, vector<32x32xbf16>, vector<16x32xf32> -> vector<16x32xf32>
    %41 = arith.addf %40, %5 : vector<16x32xf32>
    %42 = arith.truncf %41 : vector<16x32xf32> to vector<16x32xbf16>
    %cst_30 = arith.constant dense<0.000000e+00> : vector<16x32xf32>
    %43 = tpu.matmul %42, %17, %cst_30 {dimension_numbers = #tpu.dot_dimension_numbers<[1], [0], [0], [1], [0, 0, 1, 1], [], []>} : vector<16x32xbf16>, vector<32x32xbf16>, vector<16x32xf32> -> vector<16x32xf32>
    %44 = vector.broadcast %25 : vector<1x32xf32> to vector<16x32xf32>
    %45 = arith.addf %43, %44 : vector<16x32xf32>
    %cst_31 = arith.constant 0.000000e+00 : f32
    %46 = vector.broadcast %cst_31 : f32 to vector<16x32xf32>
    %47 = arith.maximumf %45, %46 : vector<16x32xf32>
    %48 = arith.truncf %47 : vector<16x32xf32> to vector<16x32xbf16>
    %cst_32 = arith.constant dense<0.000000e+00> : vector<16x32xf32>
    %49 = tpu.matmul %48, %18, %cst_32 {dimension_numbers = #tpu.dot_dimension_numbers<[1], [0], [0], [1], [0, 0, 1, 1], [], []>} : vector<16x32xbf16>, vector<32x32xbf16>, vector<16x32xf32> -> vector<16x32xf32>
    %50 = arith.addf %49, %5 : vector<16x32xf32>
    %51 = vector.broadcast %26 : vector<1x32xf32> to vector<16x32xf32>
    %52 = arith.mulf %50, %51 : vector<16x32xf32>
    %53 = vector.broadcast %27 : vector<1x32xf32> to vector<16x32xf32>
    %54 = arith.addf %52, %53 : vector<16x32xf32>
    %cst_33 = arith.constant dense<0.000000e+00> : vector<16x32xf32>
    %55 = tpu.matmul %34, %19, %cst_33 {dimension_numbers = #tpu.dot_dimension_numbers<[1], [0], [0], [1], [0, 0, 1, 1], [], []>} : vector<16x32xbf16>, vector<32x32xbf16>, vector<16x32xf32> -> vector<16x32xf32>
    %56 = arith.truncf %55 : vector<16x32xf32> to vector<16x32xbf16>
    %cst_34 = arith.constant dense<0.000000e+00> : vector<16x32xf32>
    %57 = tpu.matmul %14, %56, %cst_34 {dimension_numbers = #tpu.dot_dimension_numbers<[1], [0], [0], [1], [0, 0, 1, 1], [], []>} : vector<16x16xbf16>, vector<16x32xbf16>, vector<16x32xf32> -> vector<16x32xf32>
    %58 = arith.addf %57, %5 : vector<16x32xf32>
    %59 = vector.broadcast %28 : vector<1x32xf32> to vector<16x32xf32>
    %60 = arith.mulf %58, %59 : vector<16x32xf32>
    %61 = vector.broadcast %29 : vector<1x32xf32> to vector<16x32xf32>
    %62 = arith.addf %60, %61 : vector<16x32xf32>
    %63 = arith.addf %54, %62 : vector<16x32xf32>
    %64 = arith.truncf %63 : vector<16x32xf32> to vector<16x32xbf16>
    %cst_35 = arith.constant dense<0.000000e+00> : vector<16x64xf32>
    %65 = tpu.matmul %64, %22, %cst_35 {dimension_numbers = #tpu.dot_dimension_numbers<[1], [0], [0], [1], [0, 0, 1, 1], [], []>} : vector<16x32xbf16>, vector<32x64xbf16>, vector<16x64xf32> -> vector<16x64xf32>
    %66 = vector.broadcast %33 : vector<1x64xf32> to vector<16x64xf32>
    %67 = arith.addf %65, %66 : vector<16x64xf32>
    %cst_36 = arith.constant 0.000000e+00 : f32
    %68 = vector.broadcast %cst_36 : f32 to vector<16x64xf32>
    %69 = arith.maximumf %67, %68 : vector<16x64xf32>
    %70 = arith.truncf %69 : vector<16x64xf32> to vector<16x64xbf16>
    %cst_37 = arith.constant dense<0.000000e+00> : vector<16x32xf32>
    %71 = tpu.matmul %70, %20, %cst_37 {dimension_numbers = #tpu.dot_dimension_numbers<[1], [0], [0], [1], [0, 0, 1, 1], [], []>} : vector<16x64xbf16>, vector<64x32xbf16>, vector<16x32xf32> -> vector<16x32xf32>
    %72 = vector.broadcast %30 : vector<1x32xf32> to vector<16x32xf32>
    %73 = arith.addf %71, %72 : vector<16x32xf32>
    %74 = arith.addf %63, %73 : vector<16x32xf32>
    %75 = vector.broadcast %31 : vector<1x32xf32> to vector<16x32xf32>
    %76 = arith.mulf %74, %75 : vector<16x32xf32>
    %77 = vector.broadcast %32 : vector<1x32xf32> to vector<16x32xf32>
    %78 = arith.addf %76, %77 : vector<16x32xf32>
    %c1 = arith.constant 1 : index
    %c0_38 = arith.constant 0 : index
    %c0_39 = arith.constant 0 : index
    %79 = vector.load %arg10[%c1, %c0_38, %c0_39] : memref<2x160x32xbf16, #tpu.memory_space<vmem>>, vector<1x160x32xbf16>
    %80 = vector.shape_cast %79 : vector<1x160x32xbf16> to vector<160x32xbf16>
    %81 = vector.extract_strided_slice %80 {offsets = [0, 0], sizes = [32, 32], strides = [1, 1]} : vector<160x32xbf16> to vector<32x32xbf16>
    %82 = vector.extract_strided_slice %80 {offsets = [32, 0], sizes = [32, 32], strides = [1, 1]} : vector<160x32xbf16> to vector<32x32xbf16>
    %83 = vector.extract_strided_slice %80 {offsets = [64, 0], sizes = [32, 32], strides = [1, 1]} : vector<160x32xbf16> to vector<32x32xbf16>
    %84 = vector.extract_strided_slice %80 {offsets = [96, 0], sizes = [64, 32], strides = [1, 1]} : vector<160x32xbf16> to vector<64x32xbf16>
    %c1_40 = arith.constant 1 : index
    %c0_41 = arith.constant 0 : index
    %c0_42 = arith.constant 0 : index
    %85 = vector.load %arg11[%c1_40, %c0_41, %c0_42] : memref<2x32x64xbf16, #tpu.memory_space<vmem>>, vector<1x32x64xbf16>
    %86 = vector.shape_cast %85 : vector<1x32x64xbf16> to vector<32x64xbf16>
    %c1_43 = arith.constant 1 : index
    %c0_44 = arith.constant 0 : index
    %c0_45 = arith.constant 0 : index
    %87 = vector.load %arg12[%c1_43, %c0_44, %c0_45] : memref<2x9x64xf32, #tpu.memory_space<vmem>>, vector<1x9x64xf32>
    %88 = vector.shape_cast %87 : vector<1x9x64xf32> to vector<9x64xf32>
    %89 = vector.extract_strided_slice %88 {offsets = [0, 0], sizes = [1, 32], strides = [1, 1]} : vector<9x64xf32> to vector<1x32xf32>
    %90 = vector.extract_strided_slice %88 {offsets = [1, 0], sizes = [1, 32], strides = [1, 1]} : vector<9x64xf32> to vector<1x32xf32>
    %91 = vector.extract_strided_slice %88 {offsets = [2, 0], sizes = [1, 32], strides = [1, 1]} : vector<9x64xf32> to vector<1x32xf32>
    %92 = vector.extract_strided_slice %88 {offsets = [3, 0], sizes = [1, 32], strides = [1, 1]} : vector<9x64xf32> to vector<1x32xf32>
    %93 = vector.extract_strided_slice %88 {offsets = [4, 0], sizes = [1, 32], strides = [1, 1]} : vector<9x64xf32> to vector<1x32xf32>
    %94 = vector.extract_strided_slice %88 {offsets = [5, 0], sizes = [1, 32], strides = [1, 1]} : vector<9x64xf32> to vector<1x32xf32>
    %95 = vector.extract_strided_slice %88 {offsets = [6, 0], sizes = [1, 32], strides = [1, 1]} : vector<9x64xf32> to vector<1x32xf32>
    %96 = vector.extract_strided_slice %88 {offsets = [7, 0], sizes = [1, 32], strides = [1, 1]} : vector<9x64xf32> to vector<1x32xf32>
    %97 = vector.extract_strided_slice %88 {offsets = [8, 0], sizes = [1, 64], strides = [1, 1]} : vector<9x64xf32> to vector<1x64xf32>
    %98 = arith.truncf %78 : vector<16x32xf32> to vector<16x32xbf16>
    %cst_46 = arith.constant dense<0.000000e+00> : vector<32x32xf32>
    %99 = tpu.matmul %12, %98, %cst_46 {dimension_numbers = #tpu.dot_dimension_numbers<[1], [0], [0], [1], [0, 0, 1, 1], [], []>} : vector<32x16xbf16>, vector<16x32xbf16>, vector<32x32xf32> -> vector<32x32xf32>
    %100 = arith.addf %99, %11 : vector<32x32xf32>
    %cst_47 = arith.constant 0.000000e+00 : f32
    %101 = vector.broadcast %cst_47 : f32 to vector<32x32xf32>
    %102 = arith.maximumf %100, %101 : vector<32x32xf32>
    %103 = arith.truncf %102 : vector<32x32xf32> to vector<32x32xbf16>
    %cst_48 = arith.constant dense<0.000000e+00> : vector<16x32xf32>
    %104 = tpu.matmul %13, %103, %cst_48 {dimension_numbers = #tpu.dot_dimension_numbers<[1], [0], [0], [1], [0, 0, 1, 1], [], []>} : vector<16x32xbf16>, vector<32x32xbf16>, vector<16x32xf32> -> vector<16x32xf32>
    %105 = arith.addf %104, %78 : vector<16x32xf32>
    %106 = arith.truncf %105 : vector<16x32xf32> to vector<16x32xbf16>
    %cst_49 = arith.constant dense<0.000000e+00> : vector<16x32xf32>
    %107 = tpu.matmul %106, %81, %cst_49 {dimension_numbers = #tpu.dot_dimension_numbers<[1], [0], [0], [1], [0, 0, 1, 1], [], []>} : vector<16x32xbf16>, vector<32x32xbf16>, vector<16x32xf32> -> vector<16x32xf32>
    %108 = vector.broadcast %89 : vector<1x32xf32> to vector<16x32xf32>
    %109 = arith.addf %107, %108 : vector<16x32xf32>
    %cst_50 = arith.constant 0.000000e+00 : f32
    %110 = vector.broadcast %cst_50 : f32 to vector<16x32xf32>
    %111 = arith.maximumf %109, %110 : vector<16x32xf32>
    %112 = arith.truncf %111 : vector<16x32xf32> to vector<16x32xbf16>
    %cst_51 = arith.constant dense<0.000000e+00> : vector<16x32xf32>
    %113 = tpu.matmul %112, %82, %cst_51 {dimension_numbers = #tpu.dot_dimension_numbers<[1], [0], [0], [1], [0, 0, 1, 1], [], []>} : vector<16x32xbf16>, vector<32x32xbf16>, vector<16x32xf32> -> vector<16x32xf32>
    %114 = arith.addf %113, %78 : vector<16x32xf32>
    %115 = vector.broadcast %90 : vector<1x32xf32> to vector<16x32xf32>
    %116 = arith.mulf %114, %115 : vector<16x32xf32>
    %117 = vector.broadcast %91 : vector<1x32xf32> to vector<16x32xf32>
    %118 = arith.addf %116, %117 : vector<16x32xf32>
    %cst_52 = arith.constant dense<0.000000e+00> : vector<16x32xf32>
    %119 = tpu.matmul %98, %83, %cst_52 {dimension_numbers = #tpu.dot_dimension_numbers<[1], [0], [0], [1], [0, 0, 1, 1], [], []>} : vector<16x32xbf16>, vector<32x32xbf16>, vector<16x32xf32> -> vector<16x32xf32>
    %120 = arith.truncf %119 : vector<16x32xf32> to vector<16x32xbf16>
    %cst_53 = arith.constant dense<0.000000e+00> : vector<16x32xf32>
    %121 = tpu.matmul %14, %120, %cst_53 {dimension_numbers = #tpu.dot_dimension_numbers<[1], [0], [0], [1], [0, 0, 1, 1], [], []>} : vector<16x16xbf16>, vector<16x32xbf16>, vector<16x32xf32> -> vector<16x32xf32>
    %122 = arith.addf %121, %78 : vector<16x32xf32>
    %123 = vector.broadcast %92 : vector<1x32xf32> to vector<16x32xf32>
    %124 = arith.mulf %122, %123 : vector<16x32xf32>
    %125 = vector.broadcast %93 : vector<1x32xf32> to vector<16x32xf32>
    %126 = arith.addf %124, %125 : vector<16x32xf32>
    %127 = arith.addf %118, %126 : vector<16x32xf32>
    %128 = arith.truncf %127 : vector<16x32xf32> to vector<16x32xbf16>
    %cst_54 = arith.constant dense<0.000000e+00> : vector<16x64xf32>
    %129 = tpu.matmul %128, %86, %cst_54 {dimension_numbers = #tpu.dot_dimension_numbers<[1], [0], [0], [1], [0, 0, 1, 1], [], []>} : vector<16x32xbf16>, vector<32x64xbf16>, vector<16x64xf32> -> vector<16x64xf32>
    %130 = vector.broadcast %97 : vector<1x64xf32> to vector<16x64xf32>
    %131 = arith.addf %129, %130 : vector<16x64xf32>
    %cst_55 = arith.constant 0.000000e+00 : f32
    %132 = vector.broadcast %cst_55 : f32 to vector<16x64xf32>
    %133 = arith.maximumf %131, %132 : vector<16x64xf32>
    %134 = arith.truncf %133 : vector<16x64xf32> to vector<16x64xbf16>
    %cst_56 = arith.constant dense<0.000000e+00> : vector<16x32xf32>
    %135 = tpu.matmul %134, %84, %cst_56 {dimension_numbers = #tpu.dot_dimension_numbers<[1], [0], [0], [1], [0, 0, 1, 1], [], []>} : vector<16x64xbf16>, vector<64x32xbf16>, vector<16x32xf32> -> vector<16x32xf32>
    %136 = vector.broadcast %94 : vector<1x32xf32> to vector<16x32xf32>
    %137 = arith.addf %135, %136 : vector<16x32xf32>
    %138 = arith.addf %127, %137 : vector<16x32xf32>
    %139 = vector.broadcast %95 : vector<1x32xf32> to vector<16x32xf32>
    %140 = arith.mulf %138, %139 : vector<16x32xf32>
    %141 = vector.broadcast %96 : vector<1x32xf32> to vector<16x32xf32>
    %142 = arith.addf %140, %141 : vector<16x32xf32>
    %c0_57 = arith.constant 0 : index
    %c0_58 = arith.constant 0 : index
    %143 = vector.load %arg5[%c0_57, %c0_58] : memref<2x16xf32, #tpu.memory_space<vmem>>, vector<2x16xf32>
    %cst_59 = arith.constant dense<0.000000e+00> : vector<2x32xf32>
    %144 = tpu.matmul %143, %142, %cst_59 {dimension_numbers = #tpu.dot_dimension_numbers<[1], [0], [0], [1], [0, 0, 1, 1], [], []>} : vector<2x16xf32>, vector<16x32xf32>, vector<2x32xf32> -> vector<2x32xf32>
    %c0_60 = arith.constant 0 : index
    %c0_61 = arith.constant 0 : index
    %145 = vector.load %arg13[%c0_60, %c0_61] : memref<32x128xf32, #tpu.memory_space<vmem>>, vector<32x128xf32>
    %cst_62 = arith.constant dense<0.000000e+00> : vector<2x128xf32>
    %146 = tpu.matmul %144, %145, %cst_62 {dimension_numbers = #tpu.dot_dimension_numbers<[1], [0], [0], [1], [0, 0, 1, 1], [], []>} : vector<2x32xf32>, vector<32x128xf32>, vector<2x128xf32> -> vector<2x128xf32>
    %c0_63 = arith.constant 0 : index
    %c0_64 = arith.constant 0 : index
    %147 = vector.load %arg14[%c0_63, %c0_64] : memref<1x128xf32, #tpu.memory_space<vmem>>, vector<1x128xf32>
    %148 = vector.broadcast %147 : vector<1x128xf32> to vector<2x128xf32>
    %149 = arith.addf %146, %148 : vector<2x128xf32>
    %c0_65 = arith.constant 0 : index
    %c0_66 = arith.constant 0 : index
    %150 = vector.load %arg15[%c0_65, %c0_66] : memref<2x128xf32, #tpu.memory_space<vmem>>, vector<2x128xf32>
    tpu.vector_store %arg15[%c0_65, %c0_66], %149 {strides = array<i32>} : memref<2x128xf32, #tpu.memory_space<vmem>>, vector<2x128xf32>,
    return
  }
}

</mosaic_0001>

<bundles_post_ra>
// kernel: gps_fused_call.1
= control target key start
LH: loop header
LB: loop body
LE: loop exit
PB: predicated region body
PF: predicated region fallthrough
CT: control target
= control target key end

     0   :  { %v1859_v1 = vmov 0.0   ;;  %vm1860_vm0 = vmmov 0   ;;  %vm82_vm1 = vcmask 261120   ;;  %s2303_s0 = inlined_call_operand.vmem [shape: bf16[16,32], index: 0, kind: input, shape index: {}]   ;;  %s2304_s1 = inlined_call_operand.vmem [shape: bf16[32,32], index: 1, kind: input, shape index: {}]   ;;  %s2305_s2 = inlined_call_operand.vmem [shape: bf16[32,16], index: 2, kind: input, shape index: {}]   ;;  %s2306_s3 = inlined_call_operand.vmem [shape: bf16[16,32], index: 3, kind: input, shape index: {}]   ;;  %s2307_s4 = inlined_call_operand.vmem [shape: bf16[16,16], index: 4, kind: input, shape index: {}]   ;;  %s2308_s5 = inlined_call_operand.vmem [shape: f32[2,16], index: 5, kind: input, shape index: {}]   ;;  %s2309_s6 = inlined_call_operand.vmem [shape: bf16[32,32], index: 6, kind: input, shape index: {}]   ;;  %s2310_s7 = inlined_call_operand.vmem [shape: f32[1,32], index: 7, kind: input, shape index: {}]   ;;  %s2311_s8 = inlined_call_operand.vmem [shape: bf16[32,32], index: 8, kind: input, shape index: {}]   ;;  %s2312_s9 = inlined_call_operand.vmem [shape: f32[1,32], index: 9, kind: input, shape index: {}]   ;;  %s2313_s10 = inlined_call_operand.vmem [shape: bf16[2,160,32], index: 10, kind: input, shape index: {}]   ;;  %s2314_s11 = inlined_call_operand.vmem [shape: bf16[2,32,64], index: 11, kind: input, shape index: {}]   ;;  %s2315_s12 = inlined_call_operand.vmem [shape: f32[2,9,64], index: 12, kind: input, shape index: {}]   ;;  %s2316_s13 = inlined_call_operand.vmem [shape: f32[32,128], index: 13, kind: input, shape index: {}]   ;;  %s2317_s14 = inlined_call_operand.vmem [shape: f32[1,128], index: 14, kind: input, shape index: {}]   ;;  %s2318_s15 = inlined_call_operand.hbm [shape: f32[2,128], index: 15, kind: output, shape index: {}]  }
   0x1   :  { %v1800_v0 = vld [vmem:[%s2309_s6] sm:$0xff]   ;;  %1625 = vmatprep.subr.bf16.mxu0 %v1859_v1  ;;  %v1801_v2 = vld [vmem:[%s2309_s6 + $0x8] sm:$0xff]   ;;  %1629 = vmatprep.mubr.msk.bf16.mxu0 %vm1860_vm0, %v1859_v1 }
   0x2   :  { %1626 = vmatpush3.bf16.msra.mxu0 %v1800_v0  ;;  %v1803_v3 = vld [vmem:[%s2311_s8] sm:$0xff]  }
   0x3   :  { %1627 = vmatprep.subr.bf16.mxu0 %v1859_v1  ;;  %v1802_v4 = vld [vmem:[%s2303_s0] sm:$0xff]   ;;  %1633 = vmatprep.subr.bf16.mxu1 %v1803_v3 }
   0x4   :  { %1634 = vmatpush3.bf16.msra.mxu1 %v1803_v3 }
   0x6   :  { %1628 = vmatpush3.bf16.msra.mxu0 %v1801_v2 }
   0x9   :  { %1630 = vmatmul.mubr.msk.bf16.vlgmr.msra.gmra.mrb[0].mxu0 %vm82_vm1, %v1802_v4 }
   0xa   :  { %20 = vsyncpa [#allocation3], 0  ;;  %v1804_v5 = vld [vmem:[%s2311_s8 + $0x8] sm:$0xff]   ;;  %v1805_v6 = vld [vmem:[%s2304_s1] sm:$0xff]   ;;  %vm264_vm2 = vcmask 130048   ;;  %v376_v55 = vlaneseq  ;;  %vm719_vm3 = vcmask 523264  }
   0xb   :  { %1635 = vmatprep.subr.bf16.mxu1 %v1804_v5  ;;  %v1806_v7 = vld [vmem:[%s2304_s1 + $0x8] sm:$0xff]   ;;  %1637 = vmatprep.mubr.msk.bf16.mxu1 %vm82_vm1, %v1805_v6  ;;  %v1977_v8 = vld [vmem:[%s2305_s2] sm:$0xff]   ;;  %v1814_v53 = vld [vmem:[%s2313_s10 + $0x10] sm:$0xff]   ;;  %s1862_s18 = smov [#allocation2]  }
   0xc   :  { %1636 = vmatpush3.bf16.msra.mxu1 %v1804_v5  ;;  %1643 = vmatprep.mubr.msk.bf16.mxu0 %vm264_vm2, %v1977_v8  ;;  %v1471_v9 = vld [vmem:[%s2310_s7] ss:$0 sm:$0xff]  ;;  %v1993_v17 = vld [vmem:[%s2305_s2 + $0x8] sm:$0xff]   ;;  %v1815_v54 = vld [vmem:[%s2313_s10 + $0x18] sm:$0xff]   ;;  %v2058_v56 = vshrl.u32 %v376_v55, 7  ;;  %s1463_s7 = sshll.u32 %s1862_s18, 4  ;;  %s1464_s7 = int_to_ptr.vmem [resolvable:$true] %s1463_s7 }
   0xd   :  { %1647 = vmatprep.subr.bf16.mxu1 %v1859_v1  ;;  %v1476_v22 = vld [vmem:[%s2312_s9] ss:$0 sm:$0xff]  ;;  %v1811_v43 = vld [vmem:[%s2313_s10 + $0x8] sm:$0xff]   ;;  %p1840_p1 = scmp.lt.s32.totalorder %s1464_s7, %s1464_s7 }
   0xe   :  { %v2019_v41 = vld [vmem:[%s2306_s3] sm:$0xff]   ;;  %v1813_v52 = vld [vmem:[%s2313_s10 + $0x28] sm:$0xff]   ;;  %v378_v57 = vsub.s32 0, %v2058_v56 }
   0xf   :  { %1638 = vmatmul.mubr.msk.bf16.vlgmr.msra.gmra.mrb[0].mxu1 %vm82_vm1, %v1806_v7  ;;  %v1810_v42 = vld [vmem:[%s2313_s10] sm:$0xff]  }
  0x10   :  { %1651 = vmatprep.mubr.msk.bf16.mxu1 %vm1860_vm0, %v1859_v1  ;;  %v1812_v50 = vld [vmem:[%s2313_s10 + $0x20] sm:$0xff]  }
  0x11   :  { %v2064_v58 = vld [vmem:[%s2315_s12] sm:$0xff] }
  0x12   :  { %v379_v59 = vrot.slane %v2064_v58, %v378_v57 }
  0xdc   :  { %v120_v10 = vpop.f32.mrb[0].mxu0 }
  0xdd   :  { %v1631_v11 = vpop.f32.mrb[1].mxu0  ;;  %v1984_v13 = vadd.f32 %v1471_v9, %v120_v10 }
  0xde   :  { %v123_v12 = vpop.f32.mrb[2].mxu0 }
  0xdf   :  { %v1986_v14 = vadd.f32 %v1471_v9, %v123_v12  ;;  %v1632_v15 = vpop.f32.mrb[3].mxu0  ;;  %v2075_v12 = vld [vmem:[%s2307_s4] sm:$0xff]  }
  0xe0   :  { %v1817_v15 = vld [vmem:[%s2314_s11] sm:$0xff]  }
  0xe1   :  { %v253_v16 = vpack.c.bf16 %v1986_v14, %v1984_v13 }
  0xe2   :  { %v1639_v18 = vpop.f32.mrb[0].mxu1 }
  0xe3   :  { %1641 = vmatprep.subr.bf16.mxu0 %v253_v16  ;;  %v204_v19 = vpop.f32.mrb[1].mxu1  ;;  %v2003_v23 = vadd.f32 %v1639_v18, %v1476_v22  ;;  %v1819_v18 = vld [vmem:[%s2313_s10 + $0x30] sm:$0xff]  }
  0xe4   :  { %1642 = vmatpush3.bf16.msra.mxu0 %v253_v16  ;;  %v1640_v20 = vpop.f32.mrb[2].mxu1  ;;  %v2005_v24 = vadd.f32 %v1476_v22, %v204_v19  ;;  %v1820_v19 = vld [vmem:[%s2313_s10 + $0x38] sm:$0xff]  }
  0xe5   :  { %1655 = vmatprep.subr.bf16.mxu0 %v1859_v1  ;;  %v207_v21 = vpop.f32.mrb[3].mxu1  ;;  %v2007_v26 = vadd.f32 %v1640_v20, %v1476_v22 }
  0xe6   :  { %v2010_v29 = vadd.f32 %v1476_v22, %v207_v21  ;;  %v497_v21 = vsub.s32 1, %v2058_v56 }
  0xe7   :  { %1644 = vmatmul.mubr.msk.bf16.vlgmr.msra.gmra.mrb[4].mxu0 %vm264_vm2, %v1993_v17 }
  0xe8   :  { %1659 = vmatprep.mubr.msk.bf16.mxu0 %vm1860_vm0, %v1859_v1  ;;  %1656 = vmatpush3.bf16.msra.mxu0 %v1810_v42 }
  0xe9   :  { %1657 = vmatprep.subr.bf16.mxu0 %v1859_v1 }
  0xec   :  { %1658 = vmatpush3.bf16.msra.mxu0 %v1811_v43 }
  0xed   :  { %1671 = vmatprep.subr.bf16.mxu0 %v1859_v1 }
 0x1ba   :  { %v1645_v25 = vpop.f32.mrb[4].mxu0 }
 0x1bb   :  { %v314_v27 = vadd.f32 %v1645_v25, %v2003_v23  ;;  %v305_v28 = vpop.f32.mrb[5].mxu0 }
 0x1bc   :  { %v306_v30 = vadd.f32 %v305_v28, %v2005_v24  ;;  %v1646_v31 = vpop.f32.mrb[6].mxu0  ;;  %v615_v28 = vsub.s32 3, %v2058_v56 }
 0x1bd   :  { %v317_v32 = vadd.f32 %v1646_v31, %v2007_v26  ;;  %v308_v33 = vpop.f32.mrb[7].mxu0  ;;  %v322_v35 = vmax.f32 %v314_v27, 0.0  ;;  %v498_v31 = vrot.slane %v2064_v58, %v497_v21 }
 0x1be   :  { %v309_v34 = vadd.f32 %v308_v33, %v2010_v29  ;;  %v320_v37 = vmax.f32 %v306_v30, 0.0  ;;  %v621_v33 = vsub.s32 4, %v2058_v56 }
 0x1bf   :  { %v323_v36 = vmax.f32 %v317_v32, 0.0  ;;  %v503_v32 = vsub.s32 2, %v2058_v56 }
 0x1c0   :  { %v321_v38 = vmax.f32 %v309_v34, 0.0 }
 0x1c1   :  { %v325_v39 = vpack.c.bf16 %v323_v36, %v322_v35  ;;  %v616_v35 = vrot.slane %v2064_v58, %v615_v28 }
 0x1c2   :  { %v324_v40 = vpack.c.bf16 %v321_v38, %v320_v37  ;;  %v504_v38 = vrot.slane %v2064_v58, %v503_v32 }
 0x1c4   :  { %1648 = vmatpush3.bf16.msra.mxu1 %v324_v40  ;;  %v622_v40 = vrot.slane %v2064_v58, %v621_v33 }
 0x1c5   :  { %1649 = vmatprep.subr.bf16.mxu1 %v1859_v1 }
 0x1c8   :  { %1650 = vmatpush3.bf16.msra.mxu1 %v325_v39 }
 0x1c9   :  { %1663 = vmatprep.subr.bf16.mxu1 %v1859_v1 }
 0x1cb   :  { %1652 = vmatmul.mubr.msk.bf16.vlgmr.msra.gmra.mrb[4].mxu1 %vm82_vm1, %v2019_v41 }
 0x1cc   :  { %1667 = vmatprep.mubr.msk.bf16.mxu1 %vm1860_vm0, %v1859_v1  ;;  %1664 = vmatpush3.bf16.msra.mxu1 %v1814_v53 }
 0x1cd   :  { %1665 = vmatprep.subr.bf16.mxu1 %v1859_v1 }
 0x1d0   :  { %1666 = vmatpush3.bf16.msra.mxu1 %v1815_v54 }
 0x1d1   :  { %1679 = vmatprep.subr.bf16.mxu1 %v1859_v1 }
 0x29e   :  { %v368_v44 = vpop.f32.mrb[4].mxu1 }
 0x29f   :  { %v1653_v45 = vpop.f32.mrb[5].mxu1  ;;  %v369_v47 = vadd.f32 %v368_v44, %v1984_v13 }
 0x2a0   :  { %v371_v46 = vpop.f32.mrb[6].mxu1 }
 0x2a1   :  { %v372_v48 = vadd.f32 %v371_v46, %v1986_v14  ;;  %v1654_v49 = vpop.f32.mrb[7].mxu1 }
 0x2a3   :  { %v375_v51 = vpack.c.bf16 %v372_v48, %v369_v47 }
 0x2a5   :  { %1660 = vmatmul.mubr.msk.bf16.vlgmr.msra.gmra.mrb[8].mxu0 %vm82_vm1, %v375_v51 }
 0x2a6   :  { %1672 = vmatpush3.bf16.msra.mxu0 %v1812_v50  ;;  %1675 = vmatprep.mubr.msk.bf16.mxu0 %vm1860_vm0, %v1859_v1 }
 0x2a7   :  { %1673 = vmatprep.subr.bf16.mxu0 %v1859_v1 }
 0x2aa   :  { %1674 = vmatpush3.bf16.msra.mxu0 %v1813_v52 }
 0x2ab   :  { %1685 = vmatprep.subr.bf16.mxu0 %v1859_v1 }
 0x2ad   :  { %1676 = vmatmul.mubr.msk.bf16.vlgmr.msra.gmra.mrb[12].mxu0 %vm82_vm1, %v253_v16  ;;  %v1818_v16 = vld [vmem:[%s2314_s11 + $0x8] sm:$0xff]  }
 0x2ae   :  { %1689 = vmatprep.mubr.msk.bf16.mxu0 %vm1860_vm0, %v1859_v1  ;;  %1686 = vmatpush3.bf16.msra.mxu0 %v1817_v15  ;;  %v774_v15 = vsub.s32 7, %v2058_v56 }
 0x2af   :  { %1687 = vmatprep.subr.bf16.mxu0 %v1859_v1 }
 0x2b2   :  { %1688 = vmatpush3.bf16.msra.mxu0 %v1818_v16 }
 0x378   :  { %v429_v60 = vpop.f32.mrb[8].mxu0 }
 0x379   :  { %v430_v61 = vadd.f32 %v429_v60, %v379_v59  ;;  %v1661_v62 = vpop.f32.mrb[9].mxu0 }
 0x37a   :  { %v432_v63 = vpop.f32.mrb[10].mxu0 }
 0x37b   :  { %v433_v0 = vadd.f32 %v432_v63, %v379_v59  ;;  %v1662_v2 = vpop.f32.mrb[11].mxu0  ;;  %v436_v3 = vmax.f32 %v430_v61, 0.0  ;;  %v1500_v59 = vld [vmem:[%s2315_s12 + $0x8] ss:$0 sm:$0xff] }
 0x37d   :  { %v437_v4 = vmax.f32 %v433_v0, 0.0 }
 0x37f   :  { %v438_v5 = vpack.c.bf16 %v437_v4, %v436_v3 }
 0x380   :  { %v556_v6 = vpop.f32.mrb[12].mxu0 }
 0x381   :  { %1668 = vmatmul.mubr.msk.bf16.vlgmr.msra.gmra.mrb[8].mxu1 %vm82_vm1, %v438_v5  ;;  %v1677_v7 = vpop.f32.mrb[13].mxu0  ;;  %v693_v5 = vsub.s32 5, %v2058_v56 }
 0x382   :  { %v559_v9 = vpop.f32.mrb[14].mxu0  ;;  %1681 = vmatprep.mubr.msk.bf16.mxu1 %vm1860_vm0, %v1859_v1  ;;  %v768_v7 = vsub.s32 6, %v2058_v56  ;;  %v1298_v56 = vld [vmem:[%s2308_s5] sm:$0x3] }
 0x383   :  { %v563_v10 = vpack.c.bf16 %v559_v9, %v556_v6  ;;  %v1678_v11 = vpop.f32.mrb[15].mxu0  ;;  %v694_v6 = vrot.slane %v2064_v58, %v693_v5 }
 0x384   :  { %v769_v11 = vrot.slane %v2064_v58, %v768_v7 }
 0x385   :  { %1680 = vmatpush3.bf16.msra.mxu1 %v563_v10 }
 0x386   :  { %1693 = vmatprep.subr.bf16.mxu1 %v1859_v1 }
 0x389   :  { %1682 = vmatmul.mubr.msk.bf16.vlgmr.msra.gmra.mrb[12].mxu1 %vm264_vm2, %v2075_v12 }
 0x38a   :  { %1701 = vmatprep.mubr.msk.bf16.mxu1 %vm1860_vm0, %v1859_v1  ;;  %1694 = vmatpush3.bf16.msra.mxu1 %v1819_v18 }
 0x38b   :  { %1695 = vmatprep.subr.bf16.mxu1 %v1859_v1 }
 0x38e   :  { %1696 = vmatpush3.bf16.msra.mxu1 %v1820_v19 }
 0x38f   :  { %1697 = vmatprep.subr.bf16.mxu1 %v1859_v1 }
 0x454   :  { %v488_v20 = vpop.f32.mrb[8].mxu1 }
 0x455   :  { %v1669_v22 = vpop.f32.mrb[9].mxu1  ;;  %v489_v30 = vadd.f32 %v488_v20, %v1984_v13 }
 0x456   :  { %v491_v25 = vpop.f32.mrb[10].mxu1 }
 0x457   :  { %v1670_v27 = vpop.f32.mrb[11].mxu1  ;;  %v492_v34 = vadd.f32 %v491_v25, %v1986_v14  ;;  %v499_v37 = vmul.f32 %v498_v31, %v489_v30 }
 0x458   :  { %v775_v27 = vrot.slane %v2064_v58, %v774_v15 }
 0x459   :  { %v500_v44 = vmul.f32 %v498_v31, %v492_v34  ;;  %v505_v48 = vadd.f32 %v504_v38, %v499_v37 }
 0x45b   :  { %v506_v51 = vadd.f32 %v504_v38, %v500_v44 }
 0x45c   :  { %v606_v36 = vpop.f32.mrb[12].mxu1 }
 0x45d   :  { %v607_v39 = vadd.f32 %v606_v36, %v1984_v13  ;;  %v1683_v42 = vpop.f32.mrb[13].mxu1  ;;  %v1821_v13 = vld [vmem:[%s2313_s10 + $0x40] sm:$0xff]  }
 0x45e   :  { %v609_v43 = vpop.f32.mrb[14].mxu1  ;;  %1698 = vmatpush3.bf16.msra.mxu1 %v1821_v13  ;;  %v1827_v13 = vld [vmem:[%s2313_s10 + $0x60] sm:$0xff]  }
 0x45f   :  { %v617_v45 = vmul.f32 %v616_v35, %v607_v39  ;;  %v610_v46 = vadd.f32 %v609_v43, %v1986_v14  ;;  %v1684_v47 = vpop.f32.mrb[15].mxu1  ;;  %1699 = vmatprep.subr.bf16.mxu1 %v1859_v1  ;;  %v1822_v14 = vld [vmem:[%s2313_s10 + $0x48] sm:$0xff]  }
 0x461   :  { %v623_v49 = vadd.f32 %v622_v40, %v617_v45  ;;  %v618_v50 = vmul.f32 %v616_v35, %v610_v46 }
 0x462   :  { %1700 = vmatpush3.bf16.msra.mxu1 %v1822_v14  ;;  %v1828_v14 = vld [vmem:[%s2313_s10 + $0x68] sm:$0xff]  }
 0x463   :  { %v625_v52 = vadd.f32 %v623_v49, %v505_v48  ;;  %v624_v53 = vadd.f32 %v622_v40, %v618_v50  ;;  %1719 = vmatprep.subr.bf16.mxu1 %v1859_v1 }
 0x465   :  { %v626_v54 = vadd.f32 %v624_v53, %v506_v51  ;;  %v1825_v53 = vld [vmem:[%s2313_s10 + $0x70] sm:$0xff]  }
 0x467   :  { %v627_v55 = vpack.c.bf16 %v626_v54, %v625_v52 }
 0x469   :  { %1690 = vmatmul.mubr.msk.bf16.vlgmr.msra.gmra.mrb[16].mxu0 %vm82_vm1, %v627_v55  ;;  %v1826_v55 = vld [vmem:[%s2313_s10 + $0x78] sm:$0xff]  }
 0x46a   :  { %1707 = vmatprep.mubr.msk.bf16.mxu0 %vm264_vm2, %v1977_v8 }
 0x53c   :  { %v681_v60 = vpop.f32.mrb[16].mxu0 }
 0x53d   :  { %v682_v8 = vadd.f32 %v1500_v59, %v681_v60  ;;  %v1691_v61 = vpop.f32.mrb[17].mxu0 }
 0x53e   :  { %v684_v62 = vpop.f32.mrb[18].mxu0 }
 0x53f   :  { %v685_v63 = vadd.f32 %v1500_v59, %v684_v62  ;;  %v1692_v0 = vpop.f32.mrb[19].mxu0  ;;  %v688_v2 = vmax.f32 %v682_v8, 0.0  ;;  %v2202_v59 = vld [vmem:[%s2315_s12 + $0x10] sm:$0xff] }
 0x540   :  { %v908_v60 = vrot.slane %v2202_v59, %v378_v57  ;;  %v1829_v57 = vld [vmem:[%s2314_s11 + $0x10] sm:$0xff]  }
 0x541   :  { %v689_v3 = vmax.f32 %v685_v63, 0.0 }
 0x543   :  { %v690_v4 = vpack.c.bf16 %v689_v3, %v688_v2 }
 0x545   :  { %1702 = vmatmul.mubr.msk.bf16.vlgmr.msra.gmra.mrb[16].mxu1 %vm719_vm3, %v690_v4 }
 0x546   :  { %1723 = vmatprep.mubr.msk.bf16.mxu1 %vm1860_vm0, %v1859_v1 }
 0x618   :  { %v757_v9 = vpop.f32.mrb[16].mxu1 }
 0x619   :  { %v758_v10 = vadd.f32 %v757_v9, %v694_v6  ;;  %v1703_v16 = vpop.f32.mrb[17].mxu1 }
 0x61a   :  { %v760_v18 = vpop.f32.mrb[18].mxu1 }
 0x61b   :  { %v764_v19 = vadd.f32 %v758_v10, %v625_v52  ;;  %v761_v20 = vadd.f32 %v760_v18, %v694_v6  ;;  %v1704_v22 = vpop.f32.mrb[19].mxu1 }
 0x61d   :  { %v770_v25 = vmul.f32 %v769_v11, %v764_v19  ;;  %v765_v30 = vadd.f32 %v761_v20, %v626_v54  ;;  %v1830_v19 = vld [vmem:[%s2314_s11 + $0x18] sm:$0xff]   ;;  %v1831_v20 = vld [vmem:[%s2313_s10 + $0x80] sm:$0xff]  }
 0x61f   :  { %v771_v31 = vmul.f32 %v769_v11, %v765_v30  ;;  %v2146_v34 = vadd.f32 %v775_v27, %v770_v25 }
 0x621   :  { %v2148_v35 = vadd.f32 %v775_v27, %v771_v31 }
 0x623   :  { %v807_v36 = vpack.c.bf16 %v2148_v35, %v2146_v34 }
 0x625   :  { %1705 = vmatprep.subr.bf16.mxu0 %v807_v36 }
 0x626   :  { %1706 = vmatpush3.bf16.msra.mxu0 %v807_v36 }
 0x627   :  { %1711 = vmatprep.subr.bf16.mxu0 %v1859_v1 }
 0x629   :  { %1708 = vmatmul.mubr.msk.bf16.vlgmr.msra.gmra.mrb[20].mxu0 %vm264_vm2, %v1993_v17 }
 0x62a   :  { %1715 = vmatprep.mubr.msk.bf16.mxu0 %vm1860_vm0, %v1859_v1 }
 0x6fc   :  { %v1709_v58 = vpop.f32.mrb[20].mxu0 }
 0x6fd   :  { %v851_v37 = vadd.f32 %v1709_v58, %v2003_v23  ;;  %v842_v38 = vpop.f32.mrb[21].mxu0  ;;  %v1823_v23 = vld [vmem:[%s2313_s10 + $0x50] sm:$0xff]  }
 0x6fe   :  { %v843_v39 = vadd.f32 %v842_v38, %v2005_v24  ;;  %v1710_v40 = vpop.f32.mrb[22].mxu0  ;;  %1720 = vmatpush3.bf16.msra.mxu1 %v1823_v23  ;;  %v1824_v24 = vld [vmem:[%s2313_s10 + $0x58] sm:$0xff]  }
 0x6ff   :  { %v854_v42 = vadd.f32 %v1710_v40, %v2007_v26  ;;  %v845_v43 = vpop.f32.mrb[23].mxu0  ;;  %v859_v45 = vmax.f32 %v851_v37, 0.0  ;;  %1721 = vmatprep.subr.bf16.mxu1 %v1859_v1  ;;  %v1137_v37 = vrot.slane %v2202_v59, %v615_v28  ;;  %v1033_v40 = vrot.slane %v2202_v59, %v503_v32 }
 0x700   :  { %v846_v44 = vadd.f32 %v845_v43, %v2010_v29  ;;  %v857_v47 = vmax.f32 %v843_v39, 0.0  ;;  %v1143_v43 = vrot.slane %v2202_v59, %v621_v33  ;;  %v1833_v33 = vld [vmem:[%s2313_s10 + $0x90] sm:$0xff]  }
 0x701   :  { %v860_v46 = vmax.f32 %v854_v42, 0.0 }
 0x702   :  { %v858_v48 = vmax.f32 %v846_v44, 0.0  ;;  %1722 = vmatpush3.bf16.msra.mxu1 %v1824_v24 }
 0x703   :  { %v862_v17 = vpack.c.bf16 %v860_v46, %v859_v45  ;;  %1735 = vmatprep.subr.bf16.mxu1 %v1859_v1 }
 0x704   :  { %v861_v49 = vpack.c.bf16 %v858_v48, %v857_v47 }
 0x706   :  { %1712 = vmatpush3.bf16.msra.mxu0 %v861_v49 }
 0x707   :  { %1713 = vmatprep.subr.bf16.mxu0 %v1859_v1 }
 0x70a   :  { %1714 = vmatpush3.bf16.msra.mxu0 %v862_v17 }
 0x70b   :  { %1727 = vmatprep.subr.bf16.mxu0 %v1859_v1 }
 0x70d   :  { %1716 = vmatmul.mubr.msk.bf16.vlgmr.msra.gmra.mrb[24].mxu0 %vm82_vm1, %v2019_v41 }
 0x70e   :  { %1731 = vmatprep.mubr.msk.bf16.mxu0 %vm1860_vm0, %v1859_v1  ;;  %1728 = vmatpush3.bf16.msra.mxu0 %v1827_v13 }
 0x70f   :  { %1729 = vmatprep.subr.bf16.mxu0 %v1859_v1 }
 0x712   :  { %1730 = vmatpush3.bf16.msra.mxu0 %v1828_v14 }
 0x713   :  { %1743 = vmatprep.subr.bf16.mxu0 %v1859_v1 }
 0x7e0   :  { %v897_v26 = vpop.f32.mrb[24].mxu0 }
 0x7e1   :  { %v1717_v29 = vpop.f32.mrb[25].mxu0  ;;  %v898_v50 = vadd.f32 %v897_v26, %v2146_v34 }
 0x7e2   :  { %v900_v41 = vpop.f32.mrb[26].mxu0 }
 0x7e3   :  { %v901_v51 = vadd.f32 %v900_v41, %v2148_v35  ;;  %v1718_v52 = vpop.f32.mrb[27].mxu0 }
 0x7e5   :  { %v904_v54 = vpack.c.bf16 %v901_v51, %v898_v50 }
 0x7e7   :  { %1724 = vmatmul.mubr.msk.bf16.vlgmr.msra.gmra.mrb[20].mxu1 %vm82_vm1, %v904_v54 }
 0x7e8   :  { %1736 = vmatpush3.bf16.msra.mxu1 %v1825_v53  ;;  %1739 = vmatprep.mubr.msk.bf16.mxu1 %vm1860_vm0, %v1859_v1 }
 0x7e9   :  { %1737 = vmatprep.subr.bf16.mxu1 %v1859_v1 }
 0x7ec   :  { %1738 = vmatpush3.bf16.msra.mxu1 %v1826_v55 }
 0x7ed   :  { %1749 = vmatprep.subr.bf16.mxu1 %v1859_v1 }
 0x7ef   :  { %1740 = vmatmul.mubr.msk.bf16.vlgmr.msra.gmra.mrb[24].mxu1 %vm82_vm1, %v807_v36  ;;  %v1027_v36 = vrot.slane %v2202_v59, %v497_v21 }
 0x7f0   :  { %1753 = vmatprep.mubr.msk.bf16.mxu1 %vm1860_vm0, %v1859_v1  ;;  %1750 = vmatpush3.bf16.msra.mxu1 %v1829_v57  ;;  %v1372_v57 = vld [vmem:[%s2316_s13] sm:$0xff] }
 0x7f1   :  { %1751 = vmatprep.subr.bf16.mxu1 %v1859_v1 }
 0x7f4   :  { %1752 = vmatpush3.bf16.msra.mxu1 %v1830_v19 }
 0x8ba   :  { %v958_v8 = vpop.f32.mrb[20].mxu1 }
 0x8bb   :  { %v959_v61 = vadd.f32 %v958_v8, %v908_v60  ;;  %v1725_v62 = vpop.f32.mrb[21].mxu1  ;;  %v1215_v8 = vrot.slane %v2202_v59, %v693_v5 }
 0x8bc   :  { %v961_v63 = vpop.f32.mrb[22].mxu1 }
 0x8bd   :  { %v962_v0 = vadd.f32 %v961_v63, %v908_v60  ;;  %v1726_v2 = vpop.f32.mrb[23].mxu1  ;;  %v965_v3 = vmax.f32 %v959_v61, 0.0  ;;  %v1861_v60 = vmov 0.0|0.0   ;;  %v1289_v63 = vrot.slane %v2202_v59, %v768_v7  ;;  %v1373_v7 = vld [vmem:[%s2316_s13 + $0x8] sm:$0xff] }
 0x8be   :  { %1787 = vmatprep.subr.bf16.mxu1 %v1861_v60 }
 0x8bf   :  { %v966_v4 = vmax.f32 %v962_v0, 0.0 }
 0x8c1   :  { %v967_v6 = vpack.c.bf16 %v966_v4, %v965_v3 }
 0x8c2   :  { %v1085_v9 = vpop.f32.mrb[24].mxu1 }
 0x8c3   :  { %1732 = vmatmul.mubr.msk.bf16.vlgmr.msra.gmra.mrb[28].mxu0 %vm82_vm1, %v967_v6  ;;  %v1741_v10 = vpop.f32.mrb[25].mxu1 }
 0x8c4   :  { %v1088_v11 = vpop.f32.mrb[26].mxu1  ;;  %1745 = vmatprep.mubr.msk.bf16.mxu0 %vm1860_vm0, %v1859_v1  ;;  %v1295_v10 = vrot.slane %v2202_v59, %v774_v15  ;;  %v1374_v15 = vld [vmem:[%s2316_s13 + $0x10] sm:$0xff]  ;;  %v1375_v59 = vld [vmem:[%s2316_s13 + $0x18] sm:$0xff]  ;;  %s1835_s13 = scalar_lea.vmem %s1464_s7, 32 }
 0x8c5   :  { %v1092_v16 = vpack.c.bf16 %v1088_v11, %v1085_v9  ;;  %v1742_v18 = vpop.f32.mrb[27].mxu1  ;;  %p1836_p0 = scmp.ne.s32.totalorder %s1464_s7, %s1835_s13  ;;  %p1841_p2 = scmp.lt.s32.totalorder %s1835_s13, %s1835_s13 }
 0x8c7   :  { %1744 = vmatpush3.bf16.msra.mxu0 %v1092_v16  ;;  %p1842_p3 = por %p1841_p2, %p1840_p1 }
 0x8c8   :  { %1757 = vmatprep.subr.bf16.mxu0 %v1859_v1 }
 0x8c9   :  { %p1843_p4 = pnand %p1842_p3, %p1836_p0 }
 0x8cb   :  { %1746 = vmatmul.mubr.msk.bf16.vlgmr.msra.gmra.mrb[32].mxu0 %vm264_vm2, %v2075_v12  ;;  %v1832_v12 = vld [vmem:[%s2313_s10 + $0x88] sm:$0xff]  }
 0x8cc   :  { %1765 = vmatprep.mubr.msk.bf16.mxu0 %vm1860_vm0, %v1859_v1  ;;  %1758 = vmatpush3.bf16.msra.mxu0 %v1831_v20  ;;  %v1791_v20 = vpack.c.bf16 %v1373_v7, %v1372_v57 }
 0x8cd   :  { %1759 = vmatprep.subr.bf16.mxu0 %v1859_v1 }
 0x8d0   :  { %1760 = vmatpush3.bf16.msra.mxu0 %v1832_v12  ;;  %v1794_v12 = vpack.c.bf16 %v1375_v59, %v1374_v15 }
 0x8d1   :  { %1761 = vmatprep.subr.bf16.mxu0 %v1859_v1 }
 0x8d4   :  { %1762 = vmatpush3.bf16.msra.mxu0 %v1833_v33 }
 0x8d5   :  { %1763 = vmatprep.subr.bf16.mxu0 %v1859_v1 }
 0x996   :  { %v1017_v22 = vpop.f32.mrb[28].mxu0 }
 0x997   :  { %v1733_v25 = vpop.f32.mrb[29].mxu0  ;;  %v1018_v31 = vadd.f32 %v1017_v22, %v2146_v34 }
 0x998   :  { %v1020_v27 = vpop.f32.mrb[30].mxu0 }
 0x999   :  { %v1734_v30 = vpop.f32.mrb[31].mxu0  ;;  %v1021_v58 = vadd.f32 %v1020_v27, %v2148_v35  ;;  %v1028_v39 = vmul.f32 %v1027_v36, %v1018_v31  ;;  %v1558_v27 = vld [vmem:[%s2317_s14] ss:$0 sm:$0xff] }
 0x99b   :  { %v1029_v45 = vmul.f32 %v1027_v36, %v1021_v58  ;;  %v1034_v28 = vadd.f32 %v1033_v40, %v1028_v39 }
 0x99d   :  { %v1035_v23 = vadd.f32 %v1033_v40, %v1029_v45 }
 0x99e   :  { %v1127_v38 = vpop.f32.mrb[32].mxu0 }
 0x99f   :  { %v1128_v42 = vadd.f32 %v1127_v38, %v2146_v34  ;;  %v1747_v44 = vpop.f32.mrb[33].mxu0  ;;  %v1834_v34 = vld [vmem:[%s2313_s10 + $0x98] sm:$0xff]  }
 0x9a0   :  { %v1130_v21 = vpop.f32.mrb[34].mxu0  ;;  %1764 = vmatpush3.bf16.msra.mxu0 %v1834_v34 }
 0x9a1   :  { %v1138_v46 = vmul.f32 %v1137_v37, %v1128_v42  ;;  %v1131_v47 = vadd.f32 %v1130_v21, %v2148_v35  ;;  %v1748_v48 = vpop.f32.mrb[35].mxu0  ;;  %v1548_v35 = vld [vmem:[%s2315_s12 + $0x18] ss:$0 sm:$0xff] }
 0x9a3   :  { %v1144_v17 = vadd.f32 %v1143_v43, %v1138_v46  ;;  %v1139_v49 = vmul.f32 %v1137_v37, %v1131_v47 }
 0x9a5   :  { %v1146_v24 = vadd.f32 %v1144_v17, %v1034_v28  ;;  %v1145_v26 = vadd.f32 %v1143_v43, %v1139_v49 }
 0x9a7   :  { %v1147_v32 = vadd.f32 %v1145_v26, %v1035_v23 }
 0x9a9   :  { %v1148_v29 = vpack.c.bf16 %v1147_v32, %v1146_v24 }
 0x9ab   :  { %1754 = vmatmul.mubr.msk.bf16.vlgmr.msra.gmra.mrb[28].mxu1 %vm82_vm1, %v1148_v29 }
 0x9ac   :  { %1773 = vmatprep.mubr.msk.f32.mxu1 %vm1860_vm0, %v1859_v1 }
 0xa7e   :  { %v1202_v41 = vpop.f32.mrb[28].mxu1 }
 0xa7f   :  { %v1203_v50 = vadd.f32 %v1548_v35, %v1202_v41  ;;  %v1755_v51 = vpop.f32.mrb[29].mxu1 }
 0xa80   :  { %v1205_v52 = vpop.f32.mrb[30].mxu1 }
 0xa81   :  { %v1206_v53 = vadd.f32 %v1548_v35, %v1205_v52  ;;  %v1756_v54 = vpop.f32.mrb[31].mxu1  ;;  %v1209_v55 = vmax.f32 %v1203_v50, 0.0 }
 0xa83   :  { %v1210_v13 = vmax.f32 %v1206_v53, 0.0 }
 0xa85   :  { %v1211_v14 = vpack.c.bf16 %v1210_v13, %v1209_v55 }
 0xa87   :  { %1766 = vmatmul.mubr.msk.bf16.vlgmr.msra.gmra.mrb[36].mxu0 %vm719_vm3, %v1211_v14 }
 0xb5a   :  { %v1277_v61 = vpop.f32.mrb[36].mxu0 }
 0xb5b   :  { %v1278_v62 = vadd.f32 %v1277_v61, %v1215_v8  ;;  %v1767_v0 = vpop.f32.mrb[37].mxu0 }
 0xb5c   :  { %v1280_v2 = vpop.f32.mrb[38].mxu0 }
 0xb5d   :  { %v1284_v3 = vadd.f32 %v1278_v62, %v1146_v24  ;;  %v1281_v4 = vadd.f32 %v1280_v2, %v1215_v8  ;;  %v1768_v6 = vpop.f32.mrb[39].mxu0 }
 0xb5f   :  { %v1290_v9 = vmul.f32 %v1289_v63, %v1284_v3  ;;  %v1285_v11 = vadd.f32 %v1281_v4, %v1147_v32 }
 0xb61   :  { %v1291_v16 = vmul.f32 %v1289_v63, %v1285_v11  ;;  %v1296_v18 = vadd.f32 %v1295_v10, %v1290_v9 }
 0xb63   :  { %v1297_v5 = vadd.f32 %v1295_v10, %v1291_v16 }
 0xb65   :  { %v1788_v19 = vpack.c.bf16 %v1297_v5, %v1296_v18 }
 0xb67   :  { %1789 = vmatpush3.bf16.msra.mxu1 %v1788_v19 }
 0xb68   :  { %1790 = vmatprep.subr.bf16.mxu1 %v1861_v60 }
 0xb6a   :  { %1774 = vmatmul.mubr.msk.f32.vlgmr.msra.gmra.mrb[32].mxu1 %vm264_vm2, %v1298_v56 }
 0xb6b   :  { %1792 = vmatpush3.bf16.msra.mxu1 %v1791_v20  ;;  %1784 = vmatprep.mubr.msk.f32.mxu1 %vm1860_vm0, %v1859_v1 }
 0xb6c   :  { %1793 = vmatprep.subr.bf16.mxu1 %v1861_v60 }
 0xb6f   :  { %1795 = vmatpush3.bf16.msra.mxu1 %v1794_v12 }
 0xc3d   :  { %v1368_v22 = vpop.f32.mrb[32].mxu1 }
 0xc3e   :  { %v1775_v25 = vpop.f32.mrb[33].mxu1  ;;  %1785 = vmatmul.mubr.msk.f32.vlgmr.msra.gmra.mrb[34].mxu1 %vm82_vm1, %v1368_v22 }
 0xd11   :  { %v1452_v30 = vpop.f32.mrb[34].mxu1 }
 0xd12   :  { %v1453_v31 = vadd.f32 %v1558_v27, %v1452_v30  ;;  %v1786_v36 = vpop.f32.mrb[35].mxu1 }
 0xd14   :  { %1456 = vst [vmem:[#allocation2] sm:$0x3] %v1453_v31 }
 0xd15   :  { %1846 = shalt.err (!%p1843_p4)
}
 0xd16   :  { %s1847_s2 = scalar_lea.hbm %s2318_s15, 32 }
 0xd17   :  { %p1848_p5 = scmp.ne.s32.totalorder %s2318_s15, %s1847_s2  ;;  %p1851_p6 = scmp.lt.u32.totalorder %s1847_s2, %s2318_s15 }
 0xd19   :  { %p1853_p7 = pnand %p1851_p6, %p1848_p5 }
 0xd1b   :  { %1856 = shalt.err (!%p1853_p7)
}
 0xd1c   :  { %1466 = dma.vmem_to_hbm [thread:$0]  %s1464_s7, 32, %s2318_s15, [#allocation3]  }
 0xd1d   :  { %1857 = dma.done.wait [#allocation3], 32  }
 0xd1e   :  { %1858 = vsyncadd [#allocation3], 4294967264 }
 0xd1f   :  { %1470 = vsyncpa [#allocation3], 1 }

</bundles_post_ra>
